<compile_context>
chip_gen: v7x
topology: tpu7x:2x2x1
jax: 0.10.0
libtpu: 0.0.40
codegen_flags: <defaults>
</compile_context>

<pallas_src>
import functools

import jax
import jax.numpy as jnp
import numpy as np
from jax import lax
from jax.experimental import pallas as pl
from jax.experimental.pallas import tpu as pltpu

_MASK_VALUE = -1e30   # finite "-inf": exp(_MASK_VALUE - m) underflows to exactly 0


def _round_up(x, m):
    return (x + m - 1) // m * m


def _vmem_budget_bytes():
    """Per-generation VMEM budget (also requested as vmem_limit_bytes)."""
    cap = None
    try:
        cap = getattr(pltpu.get_tpu_info(), "vmem_capacity_bytes", None)
    except Exception:
        cap = None
    if not cap:
        cap = 64 * 1024 * 1024            # conservative: v7x per-TC physical VMEM
    if cap >= 128 * 1024 * 1024:          # v5e / v6e: 128 MiB physical
        return 96 * 1024 * 1024
    # 64 MiB parts (v7x): leave headroom for internal scratch / double buffers.
    return min(cap * 3 // 4, 48 * 1024 * 1024)


def _choose_tq(lq, lk_pad, d_pad, in_itemsize, out_itemsize, attn_itemsize, budget):
    """Largest MXU-friendly query tile whose working set fits `budget`."""
    # K and V stay resident (double-buffered by the pipeline): 2 arrays x 2 bufs.
    kv_resident = 2 * 2 * lk_pad * d_pad * in_itemsize
    candidates = [t for t in (1024, 512, 256, 128, 64, 32, 16, 8) if t <= lq]
    if not candidates:
        candidates = [max(8, _round_up(lq, 8))]
    for tq in candidates:
        q_tile = 2 * tq * d_pad * in_itemsize              # double-buffered input
        ctx_tile = 2 * tq * d_pad * out_itemsize           # double-buffered output
        attn_tile = 2 * tq * lk_pad * attn_itemsize        # 0 when attn not returned
        # In-kernel f32 intermediates (s, e, attn) + f32 ctx accumulator.
        interm = 3 * tq * lk_pad * 4 + 2 * tq * d_pad * 4
        if kv_resident + q_tile + ctx_tile + attn_tile + interm <= budget:
            return tq
    # TODO(synk): flash-style key-tiled fallback instead of a tiny TQ for very long L.
    return candidates[-1]


def _sdpa_kernel(q_ref, k_ref, v_ref, *out_refs, scale, num_valid_keys,
                 prob_dtype, with_attn):
    # q_ref: [TQ, Dp]    k_ref, v_ref: [Lk, Dp] (VMEM-resident across query tiles)
    # out_refs: ctx [TQ, Dp] (+ attn [TQ, Lk] when with_attn)
    ctx_ref = out_refs[0]

    q = q_ref[...]
    if scale is not None:
        # f32 path only; on the bf16 path the scale was folded into q by the
        # wrapper (fused with the bf16 cast).
        q = q * jnp.asarray(scale, dtype=q.dtype)

    # scores [TQ, Lk] = q @ k^T as an NT contraction (no XLU transpose of K);
    # f32 accumulation on the MXU.
    s = lax.dot_general(
        q, k_ref[...],
        dimension_numbers=(((1,), (1,)), ((), ())),
        preferred_element_type=jnp.float32,
    )

    if num_valid_keys is not None:
        # Zero-padded keys must not receive probability mass.
        key_idx = lax.broadcasted_iota(jnp.int32, s.shape, 1)
        s = jnp.where(key_idx < num_valid_keys, s, _MASK_VALUE)

    # Row softmax over the key axis (dim=2 of the [B, L, L] attention).
    m = jnp.max(s, axis=-1, keepdims=True)
    e = jnp.exp(s - m)
    denom = jnp.sum(e, axis=-1, keepdims=True)
    # Exact reciprocal: still an EUP op (off the VALU critical slot) and the
    # returned attention rows sum to 1 for downstream consumers.
    inv = pl.reciprocal(denom, approx=False)

    if with_attn:
        attn = e * inv
        ctx = lax.dot_general(
            attn.astype(prob_dtype), v_ref[...],
            dimension_numbers=(((1,), (0,)), ((), ())),
            preferred_element_type=jnp.float32,
        )
        out_refs[1][...] = attn.astype(out_refs[1].dtype)
    else:
        # Deferred normalization: (e @ v) * (1/denom) -> TQ*Dp multiplies instead
        # of TQ*Lk, and the (TQ, Lk) tile never goes back to HBM.
        ctx = lax.dot_general(
            e.astype(prob_dtype), v_ref[...],
            dimension_numbers=(((1,), (0,)), ((), ())),
            preferred_element_type=jnp.float32,
        )
        ctx = ctx * inv

    ctx_ref[...] = ctx.astype(ctx_ref.dtype)


def scaled_dot_product_attention(q, k, v, scale=None, attn_mask=None, *,
                                 attn_dtype=jnp.float32,
                                 return_attention=True,
                                 use_bf16_matmul=True,
                                 tq=None):
    """q, k, v: [B, L, D].  Returns (context [B, L, D], attention [B, L, L] | None).

    attn_dtype: dtype of the returned attention matrix.  The B*L*L attention
      writeback dominates HBM traffic (the roofline on v5e/v6e); pass
      jnp.bfloat16 or return_attention=False when the caller allows it.
    use_bf16_matmul: feed the MXU bf16 operands (q/k/v cast in the wrapper and
      the softmax probabilities cast for the PV matmul); accumulation stays f32.
    """
    if attn_mask is not None:
        # TODO(synk): attn_mask (masked_fill with -inf) not implemented.
        raise NotImplementedError("attn_mask is not supported")
    # NOTE: dropout is the identity (attention_dropout=0.0 in the module).

    B, L, D = q.shape
    assert k.shape == (B, L, D) and v.shape == (B, L, D)
    out_dtype = q.dtype

    in_dtype = jnp.bfloat16 if use_bf16_matmul else q.dtype
    in_itemsize = jnp.dtype(in_dtype).itemsize
    out_itemsize = jnp.dtype(out_dtype).itemsize
    # No phantom attention tile in the budget when it is not produced.
    attn_itemsize = jnp.dtype(attn_dtype).itemsize if return_attention else 0

    # Lane-dense layout: pad D and the key axis to multiples of 128 (query axis
    # to a multiple of the tile).
    d_pad = _round_up(D, 128)
    lk_pad = _round_up(L, 128)

    budget = int(_vmem_budget_bytes())
    if tq is None:
        tq = _choose_tq(_round_up(L, 8), lk_pad, d_pad,
                        in_itemsize, out_itemsize, attn_itemsize, budget)
    lq_pad = _round_up(L, tq)

    # Operand prep.  On the bf16 path the scale is folded into q here; XLA fuses
    # it with the convert that already touches q (no extra pass over HBM).
    q_in, k_in, v_in = q, k, v
    kernel_scale = scale
    if use_bf16_matmul:
        if scale is not None:
            q_in = q_in * jnp.asarray(scale, q_in.dtype)
            kernel_scale = None
        q_in = q_in.astype(jnp.bfloat16)
        k_in = k_in.astype(jnp.bfloat16)
        v_in = v_in.astype(jnp.bfloat16)

    if (lq_pad, d_pad) != (L, D):
        q_in = jnp.pad(q_in, ((0, 0), (0, lq_pad - L), (0, d_pad - D)))
    if (lk_pad, d_pad) != (L, D):
        k_in = jnp.pad(k_in, ((0, 0), (0, lk_pad - L), (0, d_pad - D)))
        v_in = jnp.pad(v_in, ((0, 0), (0, lk_pad - L), (0, d_pad - D)))

    grid = (B, lq_pad // tq)

    in_specs = (
        # q tile streams over the query axis.
        pl.BlockSpec((None, tq, d_pad), lambda b, qi: (b, qi, 0)),
        # K, V resident across query tiles (index_map ignores qi).
        # TODO(synk): pipeline_mode=pl.Buffered(1) would halve their VMEM once
        # verified to lower on all target generations.
        pl.BlockSpec((None, lk_pad, d_pad), lambda b, qi: (b, 0, 0)),
        pl.BlockSpec((None, lk_pad, d_pad), lambda b, qi: (b, 0, 0)),
    )
    out_specs = [pl.BlockSpec((None, tq, d_pad), lambda b, qi: (b, qi, 0))]
    out_shapes = [jax.ShapeDtypeStruct((B, lq_pad, d_pad), out_dtype)]
    if return_attention:
        out_specs.append(pl.BlockSpec((None, tq, lk_pad), lambda b, qi: (b, qi, 0)))
        out_shapes.append(jax.ShapeDtypeStruct((B, lq_pad, lk_pad), attn_dtype))

    kernel = functools.partial(
        _sdpa_kernel,
        scale=kernel_scale,
        num_valid_keys=L if lk_pad != L else None,
        prob_dtype=jnp.bfloat16 if use_bf16_matmul else v_in.dtype,
        with_attn=return_attention,
    )

    outs = pl.pallas_call(
        kernel,
        grid_spec=pltpu.PrefetchScalarGridSpec(
            num_scalar_prefetch=0,
            grid=grid,
            in_specs=in_specs,
            out_specs=tuple(out_specs),
        ),
        out_shape=tuple(out_shapes),
        compiler_params=pltpu.CompilerParams(
            # Batch axis parallel (megacore shards batches -> each TC keeps its
            # own K/V resident); query-tile axis sequential.
            dimension_semantics=("parallel", "arbitrary"),
            vmem_limit_bytes=budget,
        ),
    )(q_in, k_in, v_in)

    ctx = outs[0][:, :L, :D]
    attn = outs[1][:, :L, :L] if return_attention else None
    return ctx, attn


# ----------------------------------------------------------------------------
# Reference (numpy float64) and self-test.
# ----------------------------------------------------------------------------
def _bf16_round64(x):
    """Round-trip through bfloat16 (mimics the kernel's MXU operand casts)."""
    x32 = jnp.asarray(np.asarray(x, np.float32))
    return np.asarray(x32.astype(jnp.bfloat16).astype(jnp.float32), dtype=np.float64)


def _reference(q, k, v, scale=None, operand_round=None, prob_round=None):
    q64 = np.asarray(q, np.float64)
    k64 = np.asarray(k, np.float64)
    v64 = np.asarray(v, np.float64)
    if scale is not None:
        q64 = q64 * float(scale)
    if operand_round is not None:
        q64, k64, v64 = operand_round(q64), operand_round(k64), operand_round(v64)
    s = np.einsum("bld,bmd->blm", q64, k64)
    s = s - s.max(axis=-1, keepdims=True)
    e = np.exp(s)
    attn = e / e.sum(axis=-1, keepdims=True)
    p = attn if prob_round is None else prob_round(attn)
    ctx = np.einsum("blm,bmd->bld", p, v64)
    return ctx, attn


if __name__ == "__main__":
    B, L, D = 2, 8, 32
    key = jax.random.PRNGKey(0)
    kq, kk, kv = jax.random.split(key, 3)
    q = jax.random.normal(kq, (B, L, D), dtype=jnp.float32)
    k = jax.random.normal(kk, (B, L, D), dtype=jnp.float32)
    v = jax.random.normal(kv, (B, L, D), dtype=jnp.float32)

    # 1. Default path: bf16 MXU operands, scale=None, attention returned.
    #    Compared against a reference using the same bf16 operand/probability
    #    rounding, so the check is tight regardless of softmax peaking.
    ctx, attn = scaled_dot_product_attention(q, k, v)
    jax.block_until_ready((ctx, attn))
    assert ctx.shape == (B, L, D) and attn.shape == (B, L, L)
    ref_ctx, ref_attn = _reference(q, k, v, operand_round=_bf16_round64,
                                   prob_round=_bf16_round64)
    assert np.allclose(np.asarray(ctx, np.float64), ref_ctx, atol=2e-2, rtol=2e-2)
    assert np.allclose(np.asarray(attn, np.float64), ref_attn, atol=2e-2, rtol=2e-2)
    # Exact-reciprocal softmax: returned rows sum to 1.
    assert np.allclose(np.asarray(attn, np.float64).sum(-1), 1.0, atol=1e-3)

    # 2. Default path, explicit scale, context only (deferred normalization,
    #    no attention writeback).
    scale = 1.0 / float(D) ** 0.5
    ctx2, attn2 = scaled_dot_product_attention(q, k, v, scale=scale,
                                               return_attention=False)
    jax.block_until_ready(ctx2)
    assert attn2 is None and ctx2.shape == (B, L, D)
    ref_ctx2, _ = _reference(q, k, v, scale=scale, operand_round=_bf16_round64)
    assert np.allclose(np.asarray(ctx2, np.float64), ref_ctx2, atol=3e-2, rtol=3e-2)

    # 3. f32 MXU path (in-kernel scale fold).  Tolerance sized for the
    #    backend-default f32 matmul precision on TPU (bf16-pass level).
    ctx3, attn3 = scaled_dot_product_attention(q, k, v, scale=scale,
                                               use_bf16_matmul=False)
    jax.block_until_ready((ctx3, attn3))
    ref_ctx3, ref_attn3 = _reference(q, k, v, scale=scale)
    assert np.allclose(np.asarray(ctx3, np.float64), ref_ctx3, atol=6e-2, rtol=6e-2)
    assert np.allclose(np.asarray(attn3, np.float64), ref_attn3, atol=6e-2, rtol=6e-2)

    print("KERNEL_OK")
</pallas_src>

<mosaic_0001>
module attributes {stable_mosaic.version = 11 : i64} {
  func.func @_sdpa_kernel(%arg0: i32, %arg1: i32, %arg2: memref<1x8x128xbf16, #tpu.memory_space<vmem>>, %arg3: memref<1x128x128xbf16, #tpu.memory_space<vmem>>, %arg4: memref<1x128x128xbf16, #tpu.memory_space<vmem>>, %arg5: memref<1x8x128xf32, #tpu.memory_space<vmem>>, %arg6: memref<1x8x128xf32, #tpu.memory_space<vmem>>) attributes {dimension_semantics = [#tpu.dimension_semantics<parallel>, #tpu.dimension_semantics<arbitrary>], iteration_bounds = array<i64: 2, 1>, scalar_prefetch = 0 : i64, scratch_operands = 0 : i64, tpu.core_type = #tpu.core_type<tc>, window_params = [{transform_indices = @transform_0, window_bounds = array<i64: 1, 8, 128>}, {transform_indices = @transform_1, window_bounds = array<i64: 1, 128, 128>}, {transform_indices = @transform_2, window_bounds = array<i64: 1, 128, 128>}, {transform_indices = @transform_3, window_bounds = array<i64: 1, 8, 128>}, {transform_indices = @transform_4, window_bounds = array<i64: 1, 8, 128>}]} {
    %c0 = arith.constant 0 : index
    %c0_0 = arith.constant 0 : index
    %c0_1 = arith.constant 0 : index
    %0 = vector.load %arg2[%c0, %c0_0, %c0_1] : memref<1x8x128xbf16, #tpu.memory_space<vmem>>, vector<1x8x128xbf16>
    %1 = vector.shape_cast %0 : vector<1x8x128xbf16> to vector<8x128xbf16>
    %c0_2 = arith.constant 0 : index
    %c0_3 = arith.constant 0 : index
    %c0_4 = arith.constant 0 : index
    %2 = vector.load %arg3[%c0_2, %c0_3, %c0_4] : memref<1x128x128xbf16, #tpu.memory_space<vmem>>, vector<1x128x128xbf16>
    %3 = vector.shape_cast %2 : vector<1x128x128xbf16> to vector<128x128xbf16>
    %cst = arith.constant dense<0.000000e+00> : vector<8x128xf32>
    %4 = tpu.matmul %1, %3, %cst {dimension_numbers = #tpu.dot_dimension_numbers<[1], [1], [0], [0], [0, 0, 1, 0], [], []>} : vector<8x128xbf16>, vector<128x128xbf16>, vector<8x128xf32> -> vector<8x128xf32>
    %5 = tpu.iota {dimensions = array<i32: 1>} : vector<8x128xi32>
    %c8_i32 = arith.constant 8 : i32
    %6 = vector.broadcast %c8_i32 : i32 to vector<8x128xi32>
    %7 = arith.cmpi slt, %5, %6 : vector<8x128xi32>
    %cst_5 = arith.constant -1.000000e+30 : f32
    %8 = vector.broadcast %cst_5 : f32 to vector<8x128xf32>
    %9 = arith.select %7, %4, %8 : vector<8x128xi1>, vector<8x128xf32>
    %cst_6 = arith.constant dense<0xFF800000> : vector<8xf32>
    %10 = vector.multi_reduction <maximumf>, %9, %cst_6 [1] : vector<8x128xf32> to vector<8xf32>
    %11 = vector.shape_cast %10 : vector<8xf32> to vector<8x1xf32>
    %12 = vector.broadcast %11 : vector<8x1xf32> to vector<8x128xf32>
    %13 = arith.subf %9, %12 : vector<8x128xf32>
    %14 = math.exp %13 : vector<8x128xf32>
    %cst_7 = arith.constant dense<0.000000e+00> : vector<8xf32>
    %15 = vector.multi_reduction <add>, %14, %cst_7 [1] : vector<8x128xf32> to vector<8xf32>
    %16 = vector.shape_cast %15 : vector<8xf32> to vector<8x1xf32>
    %17 = tpu.reciprocal %16 : vector<8x1xf32> -> vector<8x1xf32>
    %18 = vector.broadcast %17 : vector<8x1xf32> to vector<8x128xf32>
    %19 = arith.mulf %14, %18 : vector<8x128xf32>
    %20 = arith.truncf %19 : vector<8x128xf32> to vector<8x128xbf16>
    %c0_8 = arith.constant 0 : index
    %c0_9 = arith.constant 0 : index
    %c0_10 = arith.constant 0 : index
    %21 = vector.load %arg4[%c0_8, %c0_9, %c0_10] : memref<1x128x128xbf16, #tpu.memory_space<vmem>>, vector<1x128x128xbf16>
    %22 = vector.shape_cast %21 : vector<1x128x128xbf16> to vector<128x128xbf16>
    %cst_11 = arith.constant dense<0.000000e+00> : vector<8x128xf32>
    %23 = tpu.matmul %20, %22, %cst_11 {dimension_numbers = #tpu.dot_dimension_numbers<[1], [0], [0], [1], [0, 0, 1, 1], [], []>} : vector<8x128xbf16>, vector<128x128xbf16>, vector<8x128xf32> -> vector<8x128xf32>
    %c0_12 = arith.constant 0 : index
    %c0_13 = arith.constant 0 : index
    %c0_14 = arith.constant 0 : index
    %24 = vector.load %arg6[%c0_12, %c0_13, %c0_14] : memref<1x8x128xf32, #tpu.memory_space<vmem>>, vector<1x8x128xf32>
    %25 = vector.shape_cast %24 : vector<1x8x128xf32> to vector<8x128xf32>
    %26 = vector.shape_cast %19 : vector<8x128xf32> to vector<1x8x128xf32>
    tpu.vector_store %arg6[%c0_12, %c0_13, %c0_14], %26 {strides = array<i32>} : memref<1x8x128xf32, #tpu.memory_space<vmem>>, vector<1x8x128xf32>,
    %c0_15 = arith.constant 0 : index
    %c0_16 = arith.constant 0 : index
    %c0_17 = arith.constant 0 : index
    %27 = vector.load %arg5[%c0_15, %c0_16, %c0_17] : memref<1x8x128xf32, #tpu.memory_space<vmem>>, vector<1x8x128xf32>
    %28 = vector.shape_cast %27 : vector<1x8x128xf32> to vector<8x128xf32>
    %29 = vector.shape_cast %23 : vector<8x128xf32> to vector<1x8x128xf32>
    tpu.vector_store %arg5[%c0_15, %c0_16, %c0_17], %29 {strides = array<i32>} : memref<1x8x128xf32, #tpu.memory_space<vmem>>, vector<1x8x128xf32>,
    return
  }
  func.func @transform_0(%arg0: i32, %arg1: i32) -> (i32, i32, i32) {
    %c0_i32 = arith.constant 0 : i32
    %c0_i32_0 = arith.constant 0 : i32
    return %arg0, %arg1, %c0_i32 : i32, i32, i32
  }
  func.func @transform_1(%arg0: i32, %arg1: i32) -> (i32, i32, i32) {
    %c0_i32 = arith.constant 0 : i32
    %c0_i32_0 = arith.constant 0 : i32
    %c0_i32_1 = arith.constant 0 : i32
    return %arg0, %c0_i32, %c0_i32_0 : i32, i32, i32
  }
  func.func @transform_2(%arg0: i32, %arg1: i32) -> (i32, i32, i32) {
    %c0_i32 = arith.constant 0 : i32
    %c0_i32_0 = arith.constant 0 : i32
    %c0_i32_1 = arith.constant 0 : i32
    return %arg0, %c0_i32, %c0_i32_0 : i32, i32, i32
  }
  func.func @transform_3(%arg0: i32, %arg1: i32) -> (i32, i32, i32) {
    %c0_i32 = arith.constant 0 : i32
    %c0_i32_0 = arith.constant 0 : i32
    return %arg0, %arg1, %c0_i32 : i32, i32, i32
  }
  func.func @transform_4(%arg0: i32, %arg1: i32) -> (i32, i32, i32) {
    %c0_i32 = arith.constant 0 : i32
    %c0_i32_0 = arith.constant 0 : i32
    return %arg0, %arg1, %c0_i32 : i32, i32, i32
  }
}

</mosaic_0001>

<bundles_post_ra>
// kernel: tpu_custom_call.1
= control target key start
LH: loop header
LB: loop body
LE: loop exit
PB: predicated region body
PF: predicated region fallthrough
CT: control target
= control target key end

     0   :  { %s1499_s0 = inlined_call_operand.hbm [shape: bf16[2,8,128], index: 0, kind: input, shape index: {}]   ;;  %s1500_s1 = inlined_call_operand.hbm [shape: bf16[2,128,128], index: 1, kind: input, shape index: {}]   ;;  %s1501_s2 = inlined_call_operand.hbm [shape: bf16[2,128,128], index: 2, kind: input, shape index: {}]   ;;  %s1502_s3 = inlined_call_operand.hbm [shape: f32[2,8,128], index: 3, kind: output, shape index: {0}]   ;;  %s1503_s4 = inlined_call_operand.hbm [shape: f32[2,8,128], index: 4, kind: output, shape index: {1}]  }
   0x1   :  { %1513 = sst [smem:[#allocation19_spill]] %s1500_s1 }
   0x2   :  { %10 = vsyncpa [#allocation3], 0 }
   0x3   :  { %12 = vsyncpa [#allocation3 + $0x1], 0 }
   0x4   :  { %13 = vsyncpa [#allocation6], 0 }
   0x5   :  { %15 = vsyncpa [#allocation6 + $0x1], 0 }
   0x6   :  { %16 = vsyncpa [#allocation4], 0 }
   0x7   :  { %18 = vsyncpa [#allocation4 + $0x1], 0 }
   0x8   :  { %19 = vsyncpa [#allocation10], 0 }
   0x9   :  { %21 = vsyncpa [#allocation10 + $0x1], 0  ;;  %s1181_s15 = smov 0   ;;  %s1183_s16 = smov 0  }
   0xa   :  { %s1185_s17 = smov 0   ;;  %s1187_s18 = smov 0  }
   0xb   :  { %s1189_s19 = smov 0   ;;  %s1191_s20 = smov 0  }
   0xc LB: > { %1514 = sst [smem:[#allocation15_spill]] %s1133_s17  ;;  %s1212_s21 = sadd.s32 4294967295, %s1145_s20   ;;  %s1145_s20 = sphi %s1191_s20, %s27_s20   ;;  %s1141_s19 = sphi %s1189_s19, %s1541_s19   ;;  %s1137_s18 = sphi %s1187_s18, %s1540_s18   ;;  %s1133_s17 = sphi %s1185_s17, %s1536_s17   ;;  %s1129_s16 = sphi %s1183_s16, %s1539_s16   ;;  %s1125_s15 = sphi %s1181_s15, %s1538_s15  }
   0xd   : > { %s737_s22 = sadd.s32 4294967294, %s1145_s20   ;;  %s39_s23 = sadd.s32 1, %s1141_s19 }
   0xe   : > { %s48_s24 = sadd.s32 1, %s1133_s17  ;;  %p41_p0 = scmp.ge.s32.totalorder %s39_s23, 2 }
   0xf   : > { %p55_p1 = scmp.ne.s32.totalorder %s1133_s17, %s1129_s16  ;;  %p56_p2 = scmp.eq.s32.totalorder %s1145_s20, 0 }
  0x10   : > { %p61_p3 = scmp.ne.s32.totalorder %s1129_s16, %s1125_s15  ;;  %s1543_s23 = smov (%p41_p0, %s39_s23), 0 }
  0x11   : > { %1515 = sst [smem:[#allocation16_spill]] %s1543_s23  ;;  %p1224_p4 = por %p56_p2, %p55_p1 }
  0x12   : > { %p62_p5 = scmp.eq.s32.totalorder %s1212_s21, 0  ;;  %s43_s26 = ssub.s32 %s1141_s19, %s1543_s23 }
  0x13   : > { %p139_p6 = scmp.eq.s32.totalorder %s1212_s21, 1  ;;  %p46_p7 = scmp.eq.s32.totalorder %s43_s26, 0 }
  0x14   : > { %p1232_p8 = por %p62_p5, %p61_p3  ;;  %p145_p10 = scmp.eq.s32.totalorder %s737_s22, 1 }
  0x15   : > { %p1236_p9 = por %p139_p6, %p55_p1  ;;  %p863_p13 = scmp.lt.s32.totalorder %s1145_s20, 2 }
  0x16   : > { %s1517_s27 = scalar_select %p1232_p8, 1, 0 }
  0x17   : > { %s1518_s28 = scalar_select %p1236_p9, 1, 0 }
  0x18   : > { %s1241_s29 = scalar_select %p46_p7, %s1133_s17, %s48_s24  }
  0x19   : > { %p1243_p11 = por %p145_p10, %p61_p3  ;;  %s1250_s5 = sand.u32 1, %s1133_s17  }
  0x1a   : > { %1519 = sst [smem:[#allocation17_spill]] %s1241_s29  ;;  %s212_s6 = sand.u32 1, %s1145_s20  }
  0x1b   : > { %s1520_s30 = scalar_select %p1243_p11, 1, 0 }
  0x1c   : > { %s1504_s7 = sshll.u32 %s1250_s5, 6  ;;  %p1256_p0 = pnand %p863_p13, %p1224_p4 }
  0x1d   : > { %1521 = sst [smem:[#allocation18_spill]] %s1520_s30  ;;  %s776_s9 = sshll.u32 %s1141_s19, 10 }
  0x1e   : > { %s1522_s8 = scalar_select %p1256_p0, 1, 0 }
  0x1f   : > { %s1523_s1 = sld [smem:[#allocation19_spill]]  ;;  %s216_s13 = scalar_lea.vmem [#allocation5], %s1504_s7 }
  0x20   : > { %s223_s14 = sshll.u32 %s216_s13, 4  ;;  %s1272_s22 = scalar_lea.sflag [#allocation6], %s212_s6  ;;  %s1270_s14 = int_to_ptr.vmem [resolvable:$true] %s223_s14 }
  0x21   : > { %p1278_p2 = pneg %p1256_p0 }
  0x25   : > { %s1266_s12 = scalar_lea.hbm %s1523_s1, %s776_s9  ;;  %s942_s11 = scalar_lea.hbm %s1523_s1, 2048 }
  0x26   : > { %s937_s24 = scalar_lea.hbm %s1266_s12, 1024  ;;  %p943_p5 = scmp.lt.u32.totalorder %s1266_s12, %s1523_s1 }
  0x27   : > { %p938_p1 = scmp.ne.s32.totalorder %s1266_s12, %s937_s24  ;;  %p944_p6 = scmp.lt.u32.totalorder %s942_s11, %s937_s24 }
  0x28   : > { %p946_p10 = scmp.lt.u32.totalorder %s937_s24, %s1266_s12 }
  0x29   : > { %p940_p3 = pnand %p1278_p2, %p938_p1  ;;  %p945_p7 = por %p944_p6, %p943_p5 }
  0x2b   : > { %p941_p4 = pneg %p940_p3  ;;  %p947_p13 = por %p946_p10, %p945_p7 }
  0x2d   : > { %p948_p12 = pnand %p947_p13, %p941_p4 }
  0x2f   : > { %951 = shalt.err (!%p948_p12)
}
  0x30   : > { %s952_s6 = scalar_lea.vmem %s1270_s14, 1024  ;;  %s1147_s26 = smov [#allocation5]  }
  0x31   : > { %p953_p1 = scmp.ne.s32.totalorder %s1270_s14, %s952_s6  ;;  %s957_s10 = sshll.u32 %s1147_s26, 4  ;;  %s958_s10 = int_to_ptr.vmem [resolvable:$false] %s957_s10 }
  0x32   : > { %s959_s7 = scalar_lea.vmem %s958_s10, 2048  ;;  %p960_p9 = scmp.lt.s32.totalorder %s1270_s14, %s958_s10 }
  0x33   : > { %p955_p3 = pnand %p953_p1, %p1278_p2  ;;  %p961_p8 = scmp.lt.s32.totalorder %s959_s7, %s952_s6 }
  0x35   : > { %p956_p11 = pneg %p955_p3  ;;  %p962_p5 = por %p961_p8, %p960_p9 }
  0x37   : > { %p963_p6 = pnand %p962_p5, %p956_p11 }
  0x39   : > { %966 = shalt.err (!%p963_p6)
}
  0x3a   : > { %s1510_s24 = smov 64   ;;  %s1149_s11 = smov 4  }
  0x3b   : > { %852 = dma.hbm_to_vmem [thread:$0]  (!%p1256_p0), %s1266_s12, 1024, %s1270_s14, %s1272_s22, %s1510_s24, %s1510_s24, %s1149_s11  }
  0x3c   : > { %s1310_s26 = scalar_lea.hbm %s1501_s2, %s776_s9  ;;  %p748_p8 = scmp.ge.s32.totalorder %s1145_s20, 1 }
  0x3d   : > { %s1525_s10 = sshll.u32 %s1250_s5, 6  ;;  %p252_p9 = scmp.lt.s32.totalorder %s1145_s20, 3 }
  0x3e   : > { %s237_s7 = scalar_lea.vmem [#allocation7], %s1525_s10  ;;  %s740_s29 = sshll.u32 %s1250_s5, 2 }
  0x3f   : > { %s244_s1 = sshll.u32 %s237_s7, 4  ;;  %p1316_p11 = pnand %p748_p8, %p252_p9  ;;  %s1327_s1 = int_to_ptr.vmem [resolvable:$true] %s244_s1 }
  0x40   : > { %s741_s17 = sshll.u32 %s1141_s19, 6  ;;  %s197_s9 = scalar_lea.vmem [#allocation2], %s740_s29 }
  0x41   : > { %s1526_s23 = scalar_select %p1316_p11, 1, 0 }
  0x42   : > { %s1325_s14 = scalar_lea.hbm %s1499_s0, %s741_s17  ;;  %s205_s13 = sshll.u32 %s197_s9, 4  ;;  %s206_s13 = int_to_ptr.vmem [resolvable:$true] %s205_s13 }
  0x43   : > { %s194_s6 = scalar_lea.sflag [#allocation3], %s1250_s5  ;;  %s967_s10 = scalar_lea.hbm %s1325_s14, 64 }
  0x44   : > { %p968_p12 = scmp.ne.s32.totalorder %s1325_s14, %s967_s10  ;;  %s972_s17 = scalar_lea.hbm %s1499_s0, 128 }
  0x45   : > { %p973_p10 = scmp.lt.u32.totalorder %s1325_s14, %s1499_s0  ;;  %p974_p13 = scmp.lt.u32.totalorder %s972_s17, %s967_s10 }
  0x46   : > { %p970_p4 = pnand %p968_p12, %p1278_p2  ;;  %p976_p3 = scmp.lt.u32.totalorder %s967_s10, %s1325_s14 }
  0x47   : > { %p975_p1 = por %p974_p13, %p973_p10 }
  0x48   : > { %p971_p7 = pneg %p970_p4 }
  0x49   : > { %p977_p5 = por %p976_p3, %p975_p1 }
  0x4b   : > { %p978_p6 = pnand %p977_p5, %p971_p7 }
  0x4d   : > { %981 = shalt.err (!%p978_p6)
}
  0x4e   : > { %s982_s29 = scalar_lea.vmem %s206_s13, 64  ;;  %s1150_s5 = smov [#allocation2]  }
  0x4f   : > { %p983_p8 = scmp.ne.s32.totalorder %s206_s13, %s982_s29  ;;  %s987_s9 = sshll.u32 %s1150_s5, 4  ;;  %s988_s9 = int_to_ptr.vmem [resolvable:$false] %s987_s9 }
  0x50   : > { %s989_s24 = scalar_lea.vmem %s988_s9, 128  ;;  %p990_p4 = scmp.lt.s32.totalorder %s206_s13, %s988_s9 }
  0x51   : > { %p985_p9 = pnand %p983_p8, %p1278_p2  ;;  %p991_p11 = scmp.lt.s32.totalorder %s989_s24, %s982_s29 }
  0x53   : > { %p986_p12 = pneg %p985_p9  ;;  %p992_p0 = por %p991_p11, %p990_p4 }
  0x55   : > { %p993_p10 = pnand %p992_p0, %p986_p12 }
  0x57   : > { %996 = shalt.err (!%p993_p10)
}
  0x58   : > { %p1527_p13 = scmp.ne.s32.totalorder %s1522_s8, 0  ;;  %s997_s10 = scalar_lea.hbm %s1310_s26, 1024 }
  0x59   : > { %p998_p7 = scmp.ne.s32.totalorder %s1310_s26, %s997_s10  ;;  %s1002_s30 = scalar_lea.hbm %s1501_s2, 2048 }
  0x5a   : > { %849 = dma.hbm_to_vmem [thread:$0]  (!%p1527_p13), %s1325_s14, 64, %s206_s13, %s194_s6  }
  0x5b   : > { %p1000_p1 = pnand %p998_p7, %p1278_p2  ;;  %p1003_p0 = scmp.lt.u32.totalorder %s1310_s26, %s1501_s2 }
  0x5c   : > { %p1004_p11 = scmp.lt.u32.totalorder %s1002_s30, %s997_s10  ;;  %p1006_p6 = scmp.lt.u32.totalorder %s997_s10, %s1310_s26 }
  0x5d   : > { %p1001_p3 = pneg %p1000_p1 }
  0x5e   : > { %p1005_p5 = por %p1004_p11, %p1003_p0 }
  0x60   : > { %p1007_p8 = por %p1006_p6, %p1005_p5 }
  0x62   : > { %p1008_p9 = pnand %p1007_p8, %p1001_p3 }
  0x64   : > { %1011 = shalt.err (!%p1008_p9)
}
  0x65   : > { %s1012_s14 = scalar_lea.vmem %s1327_s1, 1024  ;;  %s1151_s13 = smov [#allocation7]  }
  0x66   : > { %p1013_p12 = scmp.ne.s32.totalorder %s1327_s1, %s1012_s14  ;;  %s1017_s6 = sshll.u32 %s1151_s13, 4  ;;  %s1018_s6 = int_to_ptr.vmem [resolvable:$false] %s1017_s6 }
  0x67   : > { %s1019_s5 = scalar_lea.vmem %s1018_s6, 2048  ;;  %p1020_p7 = scmp.lt.s32.totalorder %s1327_s1, %s1018_s6 }
  0x68   : > { %p1015_p4 = pnand %p1013_p12, %p1278_p2  ;;  %p1021_p1 = scmp.lt.s32.totalorder %s1019_s5, %s1012_s14 }
  0x6a   : > { %p1016_p10 = pneg %p1015_p4  ;;  %p1022_p0 = por %p1021_p1, %p1020_p7 }
  0x6c   : > { %p1023_p11 = pnand %p1022_p0, %p1016_p10 }
  0x6e   : > { %1026 = shalt.err (!%p1023_p11)
}
  0x6f   : > { %s1528_s9 = smov 64   ;;  %p1529_p2 = scmp.ne.s32.totalorder %s1526_s23, 0 }
  0x70   : > { %855 = dma.hbm_to_vmem [thread:$0]  (!%p1527_p13), %s1310_s26, 1024, %s1327_s1, %s1272_s22, %s1528_s9, %s1528_s9, %s1149_s11  }
  0x71   : > { %256 = sbr.rel (%p1529_p2) target bundleno = 944 (0x3b0), region = 32  ;;  %s1375_s25 = sand.u32 (!%p1529_p2), 1, %s1129_s16  }
  0x72   : > { %s749_s24 = sshll.u32 (!%p1529_p2), %s1375_s25, 2  ;;  %s259_s10 = scalar_lea.sflag (!%p1529_p2), [#allocation3], %s1375_s25 }
  0x73   : > { %s1379_s7 = scalar_lea.vmem (!%p1529_p2), [#allocation2], %s749_s24  ;;  %p1530_p3 = scmp.ne.s32.totalorder (!%p1529_p2), %s1517_s27, 0 }
  0x78   : > { %1108 = dma.done.wait (%p1530_p3), %s259_s10, 64  }
  0x79   : > { %1110 = vsyncadd (%p1530_p3), %s259_s10, 4294967232  ;;  %s267_s1 = sand.u32 1, %s1212_s21   ;;  %s750_s23 = sshll.u32 %s1375_s25, 6 }
  0x7a   : > { %s268_s8 = scalar_lea.sflag [#allocation6], %s267_s1  ;;  %s271_s22 = scalar_lea.vmem [#allocation5], %s750_s23 }
  0x7b   : > { %1112 = dma.done.wait (%p1530_p3), %s268_s8, 2048  }
  0x7c   : > { %1114 = vsyncadd (%p1530_p3), %s268_s8, 4294965248  ;;  %v1152_v0 = vmov 0.0   ;;  %vm1153_vm0 = vmmov 0   ;;  %v917_v1 = vld [vmem:[%s271_s22] sm:$0xff]   ;;  %v918_v2 = vld [vmem:[%s271_s22 + $0x8] sm:$0xff]   ;;  %v426_v10 = vlaneseq  ;;  %s280_s21 = scalar_lea.vmem [#allocation7], %s750_s23 }
  0x7d   : > { %796 = vmatprep.subr.bf16.mxu0 %v1152_v0  ;;  %812 = vmatprep.mubr.msk.bf16.mxu0 %vm1153_vm0, %v1152_v0  ;;  %v919_v3 = vld [vmem:[%s271_s22 + $0x10] sm:$0xff]   ;;  %v920_v4 = vld [vmem:[%s271_s22 + $0x18] sm:$0xff]   ;;  %v921_v5 = vld [vmem:[%s271_s22 + $0x20] sm:$0xff]   ;;  %s752_s27 = sshll.u32 %s1375_s25, 3  ;;  %s772_s26 = sshll.u32 %s1137_s18, 7 }
  0x7e   : > { %816 = vmatprep.subr.bf16.mxu1 %v1152_v0  ;;  %832 = vmatprep.mubr.msk.bf16.mxu1 %vm1153_vm0, %v1152_v0  ;;  %v922_v6 = vld [vmem:[%s271_s22 + $0x28] sm:$0xff]   ;;  %v923_v7 = vld [vmem:[%s271_s22 + $0x30] sm:$0xff]   ;;  %v924_v8 = vld [vmem:[%s271_s22 + $0x38] sm:$0xff]   ;;  %v427_v11 = vand.u32 127, %v426_v10  ;;  %s319_s11 = scalar_lea.vmem [#allocation9], %s752_s27  ;;  %s1423_s12 = scalar_lea.hbm %s1503_s4, %s772_s26 }
  0x7f   : > { %797 = vmatpush3.bf16.xpose.msra.mxu0 %v917_v1  ;;  %v321_v9 = vld [vmem:[%s1379_s7] sm:$0xf]  ;;  %v925_v17 = vld [vmem:[%s280_s21] sm:$0xff]   ;;  %v926_v18 = vld [vmem:[%s280_s21 + $0x8] sm:$0xff]   ;;  %s580_s29 = sshll.u32 %s319_s11, 4  ;;  %s552_s14 = scalar_lea.sflag [#allocation10], %s1375_s25  ;;  %s581_s29 = int_to_ptr.vmem [resolvable:$true] %s580_s29 }
  0x80   : > { %798 = vmatprep.subr.bf16.mxu0 %v1152_v0  ;;  %vm428_vm1 = vcmp.lt.s32.totalorder %v427_v11, 8  ;;  %817 = vmatpush3.bf16.msra.mxu1 %v925_v17  ;;  %v927_v19 = vld [vmem:[%s280_s21 + $0x10] sm:$0xff]   ;;  %v928_v20 = vld [vmem:[%s280_s21 + $0x18] sm:$0xff]   ;;  %v929_v25 = vld [vmem:[%s280_s21 + $0x20] sm:$0xff]   ;;  %s1027_s13 = scalar_lea.vmem %s581_s29, 128  ;;  %p1531_p5 = scmp.ne.s32.totalorder %s1518_s28, 0 }
  0x81   : > { %818 = vmatprep.subr.bf16.mxu1 %v1152_v0  ;;  %v930_v26 = vld [vmem:[%s280_s21 + $0x28] sm:$0xff]   ;;  %v931_v27 = vld [vmem:[%s280_s21 + $0x30] sm:$0xff]   ;;  %v932_v28 = vld [vmem:[%s280_s21 + $0x38] sm:$0xff]   ;;  %p1028_p13 = scmp.ne.s32.totalorder %s581_s29, %s1027_s13  ;;  %s1154_s6 = smov [#allocation9]  }
  0x82   : > { %s1031_s5 = sshll.u32 %s1154_s6, 4  ;;  %s1032_s5 = int_to_ptr.vmem [resolvable:$false] %s1031_s5 }
  0x83   : > { %p1029_p6 = pnand %p1028_p13, %p1531_p5  ;;  %s1033_s9 = scalar_lea.vmem %s1032_s5, 256 }
  0x84   : > { %819 = vmatpush3.bf16.msra.mxu1 %v926_v18  ;;  %p1034_p9 = scmp.lt.s32.totalorder %s581_s29, %s1032_s5  ;;  %p1035_p12 = scmp.lt.s32.totalorder %s1033_s9, %s1027_s13 }
  0x85   : > { %820 = vmatprep.subr.bf16.mxu1 %v1152_v0  ;;  %p1030_p8 = pneg %p1029_p6 }
  0x86   : > { %p1036_p4 = por %p1035_p12, %p1034_p9 }
  0x87   : > { %799 = vmatpush3.bf16.xpose.msra.mxu0 %v918_v2 }
  0x88   : > { %800 = vmatprep.subr.bf16.mxu0 %v1152_v0  ;;  %821 = vmatpush3.bf16.msra.mxu1 %v927_v19  ;;  %p1037_p10 = pnand %p1036_p4, %p1030_p8 }
  0x89   : > { %822 = vmatprep.subr.bf16.mxu1 %v1152_v0 }
  0x8c   : > { %823 = vmatpush3.bf16.msra.mxu1 %v928_v20 }
  0x8d   : > { %824 = vmatprep.subr.bf16.mxu1 %v1152_v0 }
  0x8f   : > { %801 = vmatpush3.bf16.xpose.msra.mxu0 %v919_v3 }
  0x90   : > { %802 = vmatprep.subr.bf16.mxu0 %v1152_v0  ;;  %825 = vmatpush3.bf16.msra.mxu1 %v929_v25 }
  0x91   : > { %826 = vmatprep.subr.bf16.mxu1 %v1152_v0 }
  0x94   : > { %827 = vmatpush3.bf16.msra.mxu1 %v930_v26 }
  0x95   : > { %828 = vmatprep.subr.bf16.mxu1 %v1152_v0 }
  0x97   : > { %803 = vmatpush3.bf16.xpose.msra.mxu0 %v920_v4 }
  0x98   : > { %804 = vmatprep.subr.bf16.mxu0 %v1152_v0  ;;  %829 = vmatpush3.bf16.msra.mxu1 %v931_v27 }
  0x99   : > { %830 = vmatprep.subr.bf16.mxu1 %v1152_v0 }
  0x9c   : > { %831 = vmatpush3.bf16.msra.mxu1 %v932_v28 }
  0x9f   : > { %805 = vmatpush3.bf16.xpose.msra.mxu0 %v921_v5 }
  0xa0   : > { %806 = vmatprep.subr.bf16.mxu0 %v1152_v0 }
  0xa7   : > { %807 = vmatpush3.bf16.xpose.msra.mxu0 %v922_v6 }
  0xa8   : > { %808 = vmatprep.subr.bf16.mxu0 %v1152_v0 }
  0xaf   : > { %809 = vmatpush3.bf16.xpose.msra.mxu0 %v923_v7 }
  0xb0   : > { %810 = vmatprep.subr.bf16.mxu0 %v1152_v0 }
  0xb7   : > { %811 = vmatpush3.bf16.xpose.msra.mxu0 %v924_v8 }
  0xbe   : > { %813 = vmatmul.mubr.bf16.vlgmr.msra.gmra.mrb[0].mxu0 %v321_v9 }
 0x191   : > { %v420_v12 = vpop.f32.mrb[0].mxu0 }
 0x192   : > { %v814_v13 = vpop.f32.mrb[1].mxu0  ;;  %v429_v14 = vsel %vm428_vm1, %v420_v12, -1e+30 }
 0x193   : > { %430 = vmax.xlane.f32.xlu0 %v429_v14  ;;  %v423_v15 = vpop.f32.mrb[2].mxu0 }
 0x194   : > { %v815_v16 = vpop.f32.mrb[3].mxu0 }
 0x220   : > { %v431_v21 = vpop.xlane.xlu0 %430 }
 0x221   : > { %v432_v22 = vsub.f32 %v429_v14, %v431_v21 }
 0x223   : > { %v433_v23 = vmul.f32 1.442695, %v432_v22 }
 0x225   : > { %933 = vpow2.f32 %v433_v23 }
 0x22f   : > { %v934_v24 = vpop.eup %933 }
 0x230   : > { %435 = vadd.xlane.f32.xlu0 %v934_v24 }
 0x2bd   : > { %v436_v29 = vpop.xlane.xlu0 %435 }
 0x2be   : > { %935 = vrcp.f32 %v436_v29 }
 0x2c8   : > { %v936_v30 = vpop.eup %935 }
 0x2c9   : > { %v438_v31 = vmul.f32 %v936_v30, %v934_v24 }
 0x2cb   : > { %v439_v32 = vpack.c.bf16 %v438_v31, %v438_v31  ;;  %544 = vst [vmem:[%s319_s11] sm:$0xff] %v438_v31 }
 0x2cd   : > { %833 = vmatmul.mubr.bf16.vlgmr.msra.gmra.mrb[0].mxu1 %v439_v32 }
 0x2ce   : > { %1040 = shalt.err (!%p1037_p10)
}
 0x2cf   : > { %s1041_s24 = scalar_lea.hbm %s1423_s12, 128  ;;  %s1045_s1 = scalar_lea.hbm %s1503_s4, 256 }
 0x2d0   : > { %p1042_p7 = scmp.ne.s32.totalorder %s1423_s12, %s1041_s24  ;;  %p1046_p11 = scmp.lt.u32.totalorder %s1423_s12, %s1503_s4 }
 0x2d1   : > { %p1047_p2 = scmp.lt.u32.totalorder %s1045_s1, %s1041_s24  ;;  %p1049_p13 = scmp.lt.u32.totalorder %s1041_s24, %s1423_s12 }
 0x2d2   : > { %p1043_p1 = pnand %p1042_p7, %p1531_p5 }
 0x2d3   : > { %p1048_p3 = por %p1047_p2, %p1046_p11 }
 0x2d4   : > { %p1044_p0 = pneg %p1043_p1 }
 0x2d5   : > { %p1050_p6 = por %p1049_p13, %p1048_p3 }
 0x2d7   : > { %p1051_p8 = pnand %p1050_p6, %p1044_p0 }
 0x2d9   : > { %1054 = shalt.err (!%p1051_p8)
}
 0x2da   : > { %843 = dma.vmem_to_hbm [thread:$0]  (%p1531_p5), %s581_s29, 128, %s1423_s12, %s552_s14  }
 0x2db   : > { %s312_s22 = scalar_lea.vmem [#allocation8], %s752_s27  ;;  %s1452_s30 = scalar_lea.hbm %s1502_s3, %s772_s26 }
 0x2dc   : > { %s566_s21 = sshll.u32 %s312_s22, 4  ;;  %s547_s13 = scalar_lea.sflag [#allocation4], %s1375_s25  ;;  %s1445_s21 = int_to_ptr.vmem [resolvable:$true] %s566_s21 }
 0x2dd   : > { %s1055_s12 = scalar_lea.vmem %s1445_s21, 128  ;;  %s1155_s27 = smov [#allocation8]  }
 0x2de   : > { %p1056_p9 = scmp.ne.s32.totalorder %s1445_s21, %s1055_s12  ;;  %s1059_s18 = sshll.u32 %s1155_s27, 4  ;;  %s1060_s18 = int_to_ptr.vmem [resolvable:$false] %s1059_s18 }
 0x2df   : > { %s1061_s29 = scalar_lea.vmem %s1060_s18, 256  ;;  %p1062_p10 = scmp.lt.s32.totalorder %s1445_s21, %s1060_s18 }
 0x2e0   : > { %p1057_p12 = pnand %p1056_p9, %p1531_p5  ;;  %p1063_p7 = scmp.lt.s32.totalorder %s1061_s29, %s1055_s12 }
 0x2e2   : > { %p1058_p4 = pneg %p1057_p12  ;;  %p1064_p1 = por %p1063_p7, %p1062_p10 }
 0x2e4   : > { %p1065_p0 = pnand %p1064_p1, %p1058_p4 }
 0x3a0   : > { %v538_v33 = vpop.f32.mrb[0].mxu1 }
 0x3a1   : > { %545 = vst [vmem:[%s312_s22] sm:$0xff] %v538_v33  ;;  %v834_v34 = vpop.f32.mrb[1].mxu1 }
 0x3a2   : > { %v541_v35 = vpop.f32.mrb[2].mxu1 }
 0x3a3   : > { %1068 = shalt.err (!%p1065_p0)
}
 0x3a4   : > { %s1069_s25 = scalar_lea.hbm %s1452_s30, 128  ;;  %s1073_s6 = scalar_lea.hbm %s1502_s3, 256 }
 0x3a5   : > { %p1070_p11 = scmp.ne.s32.totalorder %s1452_s30, %s1069_s25  ;;  %p1074_p13 = scmp.lt.u32.totalorder %s1452_s30, %s1502_s3 }
 0x3a6   : > { %p1075_p6 = scmp.lt.u32.totalorder %s1073_s6, %s1069_s25  ;;  %p1077_p9 = scmp.lt.u32.totalorder %s1069_s25, %s1452_s30 }
 0x3a7   : > { %p1071_p2 = pnand %p1070_p11, %p1531_p5 }
 0x3a8   : > { %p1076_p8 = por %p1075_p6, %p1074_p13 }
 0x3a9   : > { %p1072_p3 = pneg %p1071_p2 }
 0x3aa   : > { %p1078_p12 = por %p1077_p9, %p1076_p8 }
 0x3ac   : > { %p1079_p4 = pnand %p1078_p12, %p1072_p3 }
 0x3ae   : > { %1082 = shalt.err (!%p1079_p4)
}
 0x3af   : > { %842 = dma.vmem_to_hbm [thread:$0]  (%p1531_p5), %s1445_s21, 128, %s1452_s30, %s547_s13   ;;  %v835_v36 = vpop.f32.mrb[3].mxu1 }
 0x3b0 PF: > { %s1532_s24 = sld [smem:[#allocation18_spill]]  ;;  %s592_s10 = sand.u32 1, %s1125_s15  }
 0x3b1   : > { %p1534_p7 = scmp.ge.s32.totalorder %s1145_s20, 2  ;;  %s593_s7 = scalar_lea.sflag [#allocation4], %s592_s10 }
 0x3b6   : > { %p1533_p10 = scmp.ne.s32.totalorder %s1532_s24, 0 }
 0x3b8   : > { %p857_p1 = pnand %p1534_p7, %p1533_p10 }
 0x3ba   : > { %1116 = dma.done.wait (!%p857_p1), %s593_s7, 128  }
 0x3bb   : > { %1118 = vsyncadd (!%p857_p1), %s593_s7, 4294967168  ;;  %s602_s1 = scalar_lea.sflag [#allocation10], %s592_s10 }
 0x3bc   : > { %1120 = dma.done.wait (!%p857_p1), %s602_s1, 128  }
 0x3bd   : > { %1122 = vsyncadd (!%p857_p1), %s602_s1, 4294967168  ;;  %s27_s20 = sadd.s32 1, %s1145_s20   ;;  %s1535_s28 = sld [smem:[#allocation15_spill]] }
 0x3be   : > { %p24_p0 = scmp.ge.s32.totalorder %s27_s20, 4   ;;  %s1536_s17 = sld [smem:[#allocation17_spill]] }
 0x3bf   : > { %s1537_s23 = sld [smem:[#allocation16_spill]]  ;;  %s1538_s15 = smov %s1129_s16 }
 0x3c0   : > { %s1540_s18 = smov %s1141_s19  ;;  %26 = sbr.rel (!%p24_p0) target bundleno = 12 (0xc), region = 118 }
 0x3c3   : > { %s1539_s16 = smov %s1535_s28 }
 0x3c5   : > { %s1541_s19 = smov %s1537_s23 }
 0x3c7   :  { %607 = vsyncpa [#allocation3], 1 }
 0x3c8   :  { %609 = vsyncpa [#allocation3 + $0x1], 1 }
 0x3c9   :  { %610 = vsyncpa [#allocation6], 1 }
 0x3ca   :  { %612 = vsyncpa [#allocation6 + $0x1], 1 }
 0x3cb   :  { %613 = vsyncpa [#allocation4], 1 }
 0x3cc   :  { %615 = vsyncpa [#allocation4 + $0x1], 1 }
 0x3cd   :  { %616 = vsyncpa [#allocation10], 1 }
 0x3ce   :  { %618 = vsyncpa [#allocation10 + $0x1], 1 }

</bundles_post_ra>
